<compile_context>
chip_gen: v7x
topology: tpu7x:2x2x1
jax: 0.10.0
libtpu: 0.0.40
codegen_flags: <defaults>
</compile_context>

<pallas_src>
import functools

import jax
import jax.numpy as jnp
from jax.experimental import pallas as pl
from jax.experimental.pallas import tpu as pltpu


# ----------------------------------------------------------------------------
# Fused kernel: coord = grid @ aff (contraction-row tiled) + window reduction
# ----------------------------------------------------------------------------
def _fused_kernel(g_ref, m_ref, a_ref, o_ref, coord_ref, *,
                  hw, w, win_len, row_tile, mask_tail):
    k = pl.program_id(1)
    nk = pl.num_programs(1)

    @pl.when(k == 0)
    def _():
        coord_ref[...] = jnp.zeros_like(coord_ref)

    # ---- matmul: coord (2, hw) += grid_slab (2, tk) @ aff_slab (tk, hw) ----
    g = g_ref[0]                                  # (2, row_tile)  f32, tiny DMA
    a = a_ref[0]                                  # (row_tile, hw) contiguous slab
    if mask_tail:
        # Last block may be partial: select-out stale rows beyond hw so
        # NaN/Inf garbage can never leak into the accumulation.
        row = jax.lax.broadcasted_iota(jnp.int32, (row_tile, 1), 0) + k * row_tile
        a = jnp.where(row < hw, a, 0.0)
    coord_ref[...] += jnp.dot(g, a, preferred_element_type=jnp.float32)

    # ---- at the last contraction step the full coord map is resident -------
    @pl.when(k == nk - 1)
    def _():
        x = coord_ref[...]                        # (2, hw) f32
        inv_k = 1.0 / float(win_len * win_len)

        # Separable window sum on the flat layout (XLU lane rotates):
        # r[p] = sum_dj x[p+dj], s1[p] = sum_di r[p+di*w]  -> window sum.
        r = x
        for kj in range(1, win_len):
            r = r + pltpu.roll(x, hw - kj, axis=1)          # r[p] += x[p+kj]
        s1 = r
        for ki in range(1, win_len):
            s1 = s1 + pltpu.roll(r, hw - ki * w, axis=1)    # s1[p] += r[p+ki*w]
        center = s1 * inv_k                       # detached window mean (fwd no-op)

        # Exact two-pass: sum over window offsets of (x[p+d] - center[p])^2.
        acc = (x - center) ** 2                   # (di, dj) == (0, 0)
        for di in range(win_len):
            for dj in range(win_len):
                if di == 0 and dj == 0:
                    continue
                d = di * w + dj
                acc = acc + (pltpu.roll(x, hw - d, axis=1) - center) ** 2

        # Precomputed anchor-validity mask (1, hw) -- wrap-around / off-lattice
        # anchors contribute zero.
        total = jnp.sum(acc * m_ref[0])

        # Lane-dense (1, 8, 128) per-batch partial (single unmasked vst);
        # the wrapper reads element [i, 0, 0].
        o_ref[...] = jnp.full(o_ref.shape, total, dtype=o_ref.dtype)


# ----------------------------------------------------------------------------
# Wrapper helpers
# ----------------------------------------------------------------------------
def _vmem_capacity_bytes():
    try:
        info = pltpu.get_tpu_info()
        cap = getattr(info, "vmem_capacity_bytes", None)
        if cap:
            return int(cap)
    except Exception:
        pass
    return 64 << 20   # conservative: assume v7x-sized VMEM


def _pick_row_tile(hw, itemsize, budget):
    """Contraction-row slab size: (row_tile, hw) of aff per grid step.
    Full hw if it fits the budget; otherwise the largest multiple of 128 under
    budget, preferring an exact divisor of hw (no masked tail) if that does
    not shrink the slab by more than 2x."""
    if hw * hw * itemsize <= budget:
        return hw
    t = max(128, (budget // (hw * itemsize)) // 128 * 128)
    cand = t
    while cand >= max(128, t // 2):
        if hw % cand == 0:
            return cand
        cand -= 128
    return t


def _make_anchor_mask(h, w, win_len, stride):
    """Multiplicative f32 mask over flat positions: 1.0 on valid window
    anchors (top-left corners on the stride lattice), else 0.0."""
    oh = (h - win_len) // stride + 1
    ow = (w - win_len) // stride + 1
    r = jnp.arange(h, dtype=jnp.int32)[:, None]
    c = jnp.arange(w, dtype=jnp.int32)[None, :]
    valid = (r <= (oh - 1) * stride) & (c <= (ow - 1) * stride)
    if stride > 1:
        valid = valid & (r % stride == 0) & (c % stride == 0)
    return valid.astype(jnp.float32).reshape(1, 1, h * w)


def create_grid_flat(f_size):
    """torch affine_grid(identity, F_size, align_corners=True), permuted to
    channel-first and flattened.  Batch-invariant -> shape (1, 2, h*w)."""
    _, _, h, w = f_size
    xs = jnp.linspace(-1.0, 1.0, w, dtype=jnp.float32)
    ys = jnp.linspace(-1.0, 1.0, h, dtype=jnp.float32)
    gx = jnp.broadcast_to(xs[None, :], (h, w))
    gy = jnp.broadcast_to(ys[:, None], (h, w))
    return jnp.stack([gx, gy], axis=0).reshape(1, 2, h * w)


# ----------------------------------------------------------------------------
# Public wrapper
# ----------------------------------------------------------------------------
def concentration_detach_loss(aff, grid_flat, f_size, win_len, stride):
    b, _, h, w = f_size
    hw = h * w
    if aff.ndim == 4:
        aff = aff[:, 0]                  # drop channel dim only (safe for b==1)

    # Stream aff in its native dtype -- no wrapper-side astype round trip.
    itemsize = jnp.dtype(aff.dtype).itemsize

    cap = _vmem_capacity_bytes()
    if cap >= (100 << 20):               # v5e / v6e: 128 MiB physical VMEM
        budget, vmem_limit = 12 << 20, 64 << 20
    else:                                # v7x: 64 MiB physical VMEM
        budget, vmem_limit = 10 << 20, 44 << 20

    row_tile = _pick_row_tile(hw, itemsize, budget)
    nk = pl.cdiv(hw, row_tile)
    hw_pad = nk * row_tile
    mask_tail = (hw_pad != hw)

    grid_flat = grid_flat.reshape(1, 2, hw).astype(jnp.float32)
    if mask_tail:
        # Pad the (tiny) grid so its per-step slab slice is always in bounds.
        grid_flat = jnp.pad(grid_flat, ((0, 0), (0, 0), (0, hw_pad - hw)))
    anchor_mask = _make_anchor_mask(h, w, win_len, stride)

    oh = (h - win_len) // stride + 1
    ow = (w - win_len) // stride + 1

    kernel = functools.partial(_fused_kernel, hw=hw, w=w, win_len=win_len,
                               row_tile=row_tile, mask_tail=mask_tail)

    cost = pl.CostEstimate(
        flops=4 * b * hw * hw,
        bytes_accessed=b * hw * hw * itemsize + 2 * hw_pad * 4 + hw * 4
                       + b * 8 * 128 * 4,
        transcendentals=0)

    partial = pl.pallas_call(
        kernel,
        out_shape=jax.ShapeDtypeStruct((b, 8, 128), jnp.float32),
        grid_spec=pltpu.PrefetchScalarGridSpec(
            num_scalar_prefetch=0,
            grid=(b, nk),
            in_specs=[
                # grid: small contraction slab per step
                pl.BlockSpec((1, 2, row_tile), lambda i, k: (0, 0, k)),
                # anchor mask: resident
                pl.BlockSpec((1, 1, hw), lambda i, k: (0, 0, 0)),
                # aff: per-batch, contiguous contraction-row slabs
                pl.BlockSpec((1, row_tile, hw), lambda i, k: (i, k, 0)),
            ],
            out_specs=pl.BlockSpec((1, 8, 128), lambda i, k: (i, 0, 0)),
            scratch_shapes=[pltpu.VMEM((2, hw), jnp.float32)],
        ),
        compiler_params=pltpu.CompilerParams(
            dimension_semantics=("parallel", "arbitrary"),
            vmem_limit_bytes=vmem_limit),
        cost_estimate=cost,
    )(grid_flat, anchor_mask, aff)

    denom = b * 2 * oh * ow * win_len * win_len
    return jnp.sum(partial[:, 0, 0]) / denom


# ----------------------------------------------------------------------------
# Pure-JAX reference (mirrors the PyTorch forward) for a correctness check
# ----------------------------------------------------------------------------
def _reference(aff, grid_flat, f_size, win_len, stride):
    b, _, h, w = f_size
    if aff.ndim == 4:
        aff = aff[:, 0]
    coord = jnp.einsum('ci,bij->bcj', grid_flat.reshape(2, h * w),
                       aff.astype(jnp.float32)).reshape(b, 2, h, w)
    oh = (h - win_len) // stride + 1
    ow = (w - win_len) // stride + 1
    patches = []
    for ki in range(win_len):
        for kj in range(win_len):
            patches.append(coord[:, :, ki:ki + (oh - 1) * stride + 1:stride,
                                        kj:kj + (ow - 1) * stride + 1:stride])
    unf = jnp.stack(patches, axis=-1).reshape(b, 2, oh * ow, win_len * win_len)
    center = jnp.mean(unf, axis=3, keepdims=True)   # .detach() is a fwd no-op
    dis = (unf - center) ** 2
    return jnp.sum(dis) / dis.size


if __name__ == "__main__":
    # Module config: ConcentrationDetachLoss(win_len=3, stride=1, F_size)
    F_SIZE = (2, 4, 16, 16)      # (b, c, h, w)
    WIN_LEN = 3
    STRIDE = 1
    b, c, h, w = F_SIZE
    hw = h * w

    key = jax.random.PRNGKey(0)
    aff = jax.random.normal(key, (b, hw, hw), dtype=jnp.float32)

    grid_flat = create_grid_flat(F_SIZE)   # deterministic "parameter"

    loss = concentration_detach_loss(aff, grid_flat, F_SIZE, WIN_LEN, STRIDE)
    loss = jax.block_until_ready(loss)

    ref = _reference(aff, grid_flat, F_SIZE, WIN_LEN, STRIDE)
    assert jnp.allclose(loss, ref, rtol=5e-3, atol=1e-5), (float(loss), float(ref))

    print("KERNEL_OK")
</pallas_src>

<mosaic_0001>
module attributes {stable_mosaic.version = 11 : i64} {
  func.func @_fused_kernel(%arg0: i32, %arg1: i32, %arg2: memref<1x2x256xf32, #tpu.memory_space<vmem>>, %arg3: memref<1x1x256xf32, #tpu.memory_space<vmem>>, %arg4: memref<1x256x256xf32, #tpu.memory_space<vmem>>, %arg5: memref<1x8x128xf32, #tpu.memory_space<vmem>>, %arg6: memref<2x256xf32, #tpu.memory_space<vmem>>) attributes {dimension_semantics = [#tpu.dimension_semantics<parallel>, #tpu.dimension_semantics<arbitrary>], iteration_bounds = array<i64: 2, 1>, scalar_prefetch = 0 : i64, scratch_operands = 1 : i64, tpu.core_type = #tpu.core_type<tc>, window_params = [{transform_indices = @transform_0, window_bounds = array<i64: 1, 2, 256>}, {pipeline_mode = #tpu.pipeline_mode<synchronous>, transform_indices = @transform_1, window_bounds = array<i64: 1, 1, 256>}, {transform_indices = @transform_2, window_bounds = array<i64: 1, 256, 256>}, {transform_indices = @transform_3, window_bounds = array<i64: 1, 8, 128>}]} {
    %c0_i32 = arith.constant 0 : i32
    %0 = arith.cmpi eq, %arg1, %c0_i32 : i32
    %1 = arith.extui %0 : i1 to i32
    %c0_i32_0 = arith.constant 0 : i32
    %2 = arith.cmpi ne, %1, %c0_i32_0 : i32
    scf.if %2 {
      %cst_12 = arith.constant 0.000000e+00 : f32
      %14 = vector.broadcast %cst_12 : f32 to vector<2x256xf32>
      %c0_13 = arith.constant 0 : index
      %c0_14 = arith.constant 0 : index
      %15 = vector.load %arg6[%c0_13, %c0_14] : memref<2x256xf32, #tpu.memory_space<vmem>>, vector<2x256xf32>
      tpu.vector_store %arg6[%c0_13, %c0_14], %14 {strides = array<i32>} : memref<2x256xf32, #tpu.memory_space<vmem>>, vector<2x256xf32>,
    } else {
    }
    %c0 = arith.constant 0 : index
    %c0_1 = arith.constant 0 : index
    %c0_2 = arith.constant 0 : index
    %3 = vector.load %arg2[%c0, %c0_1, %c0_2] : memref<1x2x256xf32, #tpu.memory_space<vmem>>, vector<1x2x256xf32>
    %4 = vector.shape_cast %3 : vector<1x2x256xf32> to vector<2x256xf32>
    %c0_3 = arith.constant 0 : index
    %c0_4 = arith.constant 0 : index
    %c0_5 = arith.constant 0 : index
    %5 = vector.load %arg4[%c0_3, %c0_4, %c0_5] : memref<1x256x256xf32, #tpu.memory_space<vmem>>, vector<1x256x256xf32>
    %6 = vector.shape_cast %5 : vector<1x256x256xf32> to vector<256x256xf32>
    %c0_6 = arith.constant 0 : index
    %c0_7 = arith.constant 0 : index
    %7 = vector.load %arg6[%c0_6, %c0_7] : memref<2x256xf32, #tpu.memory_space<vmem>>, vector<2x256xf32>
    %cst = arith.constant dense<0.000000e+00> : vector<2x256xf32>
    %8 = tpu.matmul %4, %6, %cst {dimension_numbers = #tpu.dot_dimension_numbers<[1], [0], [0], [1], [0, 0, 1, 1], [], []>} : vector<2x256xf32>, vector<256x256xf32>, vector<2x256xf32> -> vector<2x256xf32>
    %9 = arith.addf %7, %8 : vector<2x256xf32>
    %c0_8 = arith.constant 0 : index
    %c0_9 = arith.constant 0 : index
    %10 = vector.load %arg6[%c0_8, %c0_9] : memref<2x256xf32, #tpu.memory_space<vmem>>, vector<2x256xf32>
    tpu.vector_store %arg6[%c0_8, %c0_9], %9 {strides = array<i32>} : memref<2x256xf32, #tpu.memory_space<vmem>>, vector<2x256xf32>,
    %c0_i32_10 = arith.constant 0 : i32
    %11 = arith.cmpi eq, %arg1, %c0_i32_10 : i32
    %12 = arith.extui %11 : i1 to i32
    %c0_i32_11 = arith.constant 0 : i32
    %13 = arith.cmpi ne, %12, %c0_i32_11 : i32
    scf.if %13 {
      %c0_12 = arith.constant 0 : index
      %c0_13 = arith.constant 0 : index
      %14 = vector.load %arg6[%c0_12, %c0_13] : memref<2x256xf32, #tpu.memory_space<vmem>>, vector<2x256xf32>
      %c255_i32 = arith.constant 255 : i32
      %15 = tpu.dynamic_rotate %14 by %c255_i32 dim 1 : vector<2x256xf32>, i32 -> vector<2x256xf32>
      %16 = arith.addf %14, %15 : vector<2x256xf32>
      %c254_i32 = arith.constant 254 : i32
      %17 = tpu.dynamic_rotate %14 by %c254_i32 dim 1 : vector<2x256xf32>, i32 -> vector<2x256xf32>
      %18 = arith.addf %16, %17 : vector<2x256xf32>
      %c240_i32 = arith.constant 240 : i32
      %19 = tpu.dynamic_rotate %18 by %c240_i32 dim 1 : vector<2x256xf32>, i32 -> vector<2x256xf32>
      %20 = arith.addf %18, %19 : vector<2x256xf32>
      %c224_i32 = arith.constant 224 : i32
      %21 = tpu.dynamic_rotate %18 by %c224_i32 dim 1 : vector<2x256xf32>, i32 -> vector<2x256xf32>
      %22 = arith.addf %20, %21 : vector<2x256xf32>
      %cst_14 = arith.constant 0.111111112 : f32
      %23 = vector.broadcast %cst_14 : f32 to vector<2x256xf32>
      %24 = arith.mulf %22, %23 : vector<2x256xf32>
      %25 = arith.subf %14, %24 : vector<2x256xf32>
      %26 = arith.mulf %25, %25 : vector<2x256xf32>
      %c255_i32_15 = arith.constant 255 : i32
      %27 = tpu.dynamic_rotate %14 by %c255_i32_15 dim 1 : vector<2x256xf32>, i32 -> vector<2x256xf32>
      %28 = arith.subf %27, %24 : vector<2x256xf32>
      %29 = arith.mulf %28, %28 : vector<2x256xf32>
      %30 = arith.addf %26, %29 : vector<2x256xf32>
      %c254_i32_16 = arith.constant 254 : i32
      %31 = tpu.dynamic_rotate %14 by %c254_i32_16 dim 1 : vector<2x256xf32>, i32 -> vector<2x256xf32>
      %32 = arith.subf %31, %24 : vector<2x256xf32>
      %33 = arith.mulf %32, %32 : vector<2x256xf32>
      %34 = arith.addf %30, %33 : vector<2x256xf32>
      %c240_i32_17 = arith.constant 240 : i32
      %35 = tpu.dynamic_rotate %14 by %c240_i32_17 dim 1 : vector<2x256xf32>, i32 -> vector<2x256xf32>
      %36 = arith.subf %35, %24 : vector<2x256xf32>
      %37 = arith.mulf %36, %36 : vector<2x256xf32>
      %38 = arith.addf %34, %37 : vector<2x256xf32>
      %c239_i32 = arith.constant 239 : i32
      %39 = tpu.dynamic_rotate %14 by %c239_i32 dim 1 : vector<2x256xf32>, i32 -> vector<2x256xf32>
      %40 = arith.subf %39, %24 : vector<2x256xf32>
      %41 = arith.mulf %40, %40 : vector<2x256xf32>
      %42 = arith.addf %38, %41 : vector<2x256xf32>
      %c238_i32 = arith.constant 238 : i32
      %43 = tpu.dynamic_rotate %14 by %c238_i32 dim 1 : vector<2x256xf32>, i32 -> vector<2x256xf32>
      %44 = arith.subf %43, %24 : vector<2x256xf32>
      %45 = arith.mulf %44, %44 : vector<2x256xf32>
      %46 = arith.addf %42, %45 : vector<2x256xf32>
      %c224_i32_18 = arith.constant 224 : i32
      %47 = tpu.dynamic_rotate %14 by %c224_i32_18 dim 1 : vector<2x256xf32>, i32 -> vector<2x256xf32>
      %48 = arith.subf %47, %24 : vector<2x256xf32>
      %49 = arith.mulf %48, %48 : vector<2x256xf32>
      %50 = arith.addf %46, %49 : vector<2x256xf32>
      %c223_i32 = arith.constant 223 : i32
      %51 = tpu.dynamic_rotate %14 by %c223_i32 dim 1 : vector<2x256xf32>, i32 -> vector<2x256xf32>
      %52 = arith.subf %51, %24 : vector<2x256xf32>
      %53 = arith.mulf %52, %52 : vector<2x256xf32>
      %54 = arith.addf %50, %53 : vector<2x256xf32>
      %c222_i32 = arith.constant 222 : i32
      %55 = tpu.dynamic_rotate %14 by %c222_i32 dim 1 : vector<2x256xf32>, i32 -> vector<2x256xf32>
      %56 = arith.subf %55, %24 : vector<2x256xf32>
      %57 = arith.mulf %56, %56 : vector<2x256xf32>
      %58 = arith.addf %54, %57 : vector<2x256xf32>
      %c0_19 = arith.constant 0 : index
      %c0_20 = arith.constant 0 : index
      %c0_21 = arith.constant 0 : index
      %59 = vector.load %arg3[%c0_19, %c0_20, %c0_21] : memref<1x1x256xf32, #tpu.memory_space<vmem>>, vector<1x1x256xf32>
      %60 = vector.shape_cast %59 : vector<1x1x256xf32> to vector<1x256xf32>
      %61 = vector.broadcast %60 : vector<1x256xf32> to vector<2x256xf32>
      %62 = arith.mulf %58, %61 : vector<2x256xf32>
      %63 = vector.shape_cast %62 : vector<2x256xf32> to vector<1x2x256xf32>
      %cst_22 = arith.constant dense<0.000000e+00> : vector<1xf32>
      %64 = vector.multi_reduction <add>, %63, %cst_22 [1, 2] : vector<1x2x256xf32> to vector<1xf32>
      %65 = vector.shape_cast %64 : vector<1xf32> to vector<1x1x1xf32>
      %66 = vector.extract %65[0, 0, 0] : f32 from vector<1x1x1xf32>
      %67 = vector.broadcast %66 : f32 to vector<1x8x128xf32>
      %c0_23 = arith.constant 0 : index
      %c0_24 = arith.constant 0 : index
      %c0_25 = arith.constant 0 : index
      %68 = vector.load %arg5[%c0_23, %c0_24, %c0_25] : memref<1x8x128xf32, #tpu.memory_space<vmem>>, vector<1x8x128xf32>
      tpu.vector_store %arg5[%c0_23, %c0_24, %c0_25], %67 {strides = array<i32>} : memref<1x8x128xf32, #tpu.memory_space<vmem>>, vector<1x8x128xf32>,
    } else {
    }
    return
  }
  func.func @transform_0(%arg0: i32, %arg1: i32) -> (i32, i32, i32) {
    %c0_i32 = arith.constant 0 : i32
    %c0_i32_0 = arith.constant 0 : i32
    %c0_i32_1 = arith.constant 0 : i32
    return %c0_i32, %c0_i32_0, %arg1 : i32, i32, i32
  }
  func.func @transform_1(%arg0: i32, %arg1: i32) -> (i32, i32, i32) {
    %c0_i32 = arith.constant 0 : i32
    %c0_i32_0 = arith.constant 0 : i32
    %c0_i32_1 = arith.constant 0 : i32
    %c0_i32_2 = arith.constant 0 : i32
    return %c0_i32, %c0_i32_0, %c0_i32_1 : i32, i32, i32
  }
  func.func @transform_2(%arg0: i32, %arg1: i32) -> (i32, i32, i32) {
    %c0_i32 = arith.constant 0 : i32
    %c0_i32_0 = arith.constant 0 : i32
    return %arg0, %arg1, %c0_i32 : i32, i32, i32
  }
  func.func @transform_3(%arg0: i32, %arg1: i32) -> (i32, i32, i32) {
    %c0_i32 = arith.constant 0 : i32
    %c0_i32_0 = arith.constant 0 : i32
    %c0_i32_1 = arith.constant 0 : i32
    return %arg0, %c0_i32, %c0_i32_0 : i32, i32, i32
  }
}

</mosaic_0001>

<bundles_post_ra>
// kernel: tpu_custom_call.1
= control target key start
LH: loop header
LB: loop body
LE: loop exit
PB: predicated region body
PF: predicated region fallthrough
CT: control target
= control target key end

     0   :  { %8 = vsyncpa [#allocation4], 0  ;;  %s1578_s0 = inlined_call_operand.hbm [shape: f32[1,2,256], index: 0, kind: input, shape index: {}]   ;;  %s1579_s1 = inlined_call_operand.vmem [shape: f32[1,1,256], index: 1, kind: input, shape index: {}]   ;;  %s1580_s2 = inlined_call_operand.hbm [shape: f32[2,256,256], index: 2, kind: input, shape index: {}]   ;;  %s1581_s3 = inlined_call_operand.hbm [shape: f32[2,8,128], index: 3, kind: output, shape index: {}]  }
   0x1   :  { %9 = vsyncpa [#allocation7], 0 }
   0x2   :  { %11 = vsyncpa [#allocation7 + $0x1], 0 }
   0x3   :  { %12 = vsyncpa [#allocation5], 0 }
   0x4   :  { %14 = vsyncpa [#allocation5 + $0x1], 0  ;;  %s1186_s12 = smov 0   ;;  %s1188_s13 = smov 0  }
   0x5   :  { %s1190_s14 = smov 0   ;;  %s1192_s15 = smov 0  }
   0x6   :  { %s1194_s16 = smov 0   ;;  %s1196_s17 = smov 0  }
   0x7 LB: > { %s836_s18 = sadd.s32 4294967295, %s1149_s17   ;;  %s837_s19 = sadd.s32 4294967294, %s1149_s17   ;;  %s1149_s17 = sphi %s1196_s17, %s20_s17   ;;  %s1145_s16 = sphi %s1194_s16, %s1609_s16   ;;  %s1141_s15 = sphi %s1192_s15, %s1608_s15   ;;  %s1137_s14 = sphi %s1190_s14, %s1607_s14   ;;  %s1133_s13 = sphi %s1188_s13, %s1606_s13   ;;  %s1129_s12 = sphi %s1186_s12, %s1605_s12  }
   0x8   : > { %s88_s20 = sadd.s32 1, %s1137_s14  ;;  %p95_p0 = scmp.ne.s32.totalorder %s1137_s14, %s1133_s13 }
   0x9   : > { %p96_p1 = scmp.eq.s32.totalorder %s1149_s17, 0  ;;  %p101_p2 = scmp.ne.s32.totalorder %s1133_s13, %s1129_s12 }
   0xa   : > { %p1224_p3 = scmp.eq.s32.totalorder %s836_s18, 0  ;;  %p125_p4 = scmp.eq.s32.totalorder %s836_s18, 1 }
   0xb   : > { %p1228_p5 = por %p96_p1, %p95_p0  ;;  %p131_p6 = scmp.eq.s32.totalorder %s837_s19, 1 }
   0xc   : > { %s1588_s21 = scalar_select %p1224_p3, 1, 0 }
   0xd   : > { %p1234_p7 = por %p1224_p3, %p101_p2  ;;  %p1238_p8 = por %p125_p4, %p95_p0 }
   0xe   : > { %p1242_p9 = por %p131_p6, %p101_p2  ;;  %p838_p10 = scmp.ge.s32.totalorder %s1149_s17, 1 }
   0xf   : > { %s1590_s23 = scalar_select %p1234_p7, 1, 0 }
  0x10   : > { %s1591_s24 = scalar_select %p1238_p8, 1, 0 }
  0x11   : > { %s1592_s25 = scalar_select %p1242_p9, 1, 0 }
  0x12   : > { %p138_p11 = scmp.lt.s32.totalorder %s1149_s17, 3  ;;  %s1151_s27 = smov [#allocation3]  }
  0x13   : > { %s154_s28 = sshll.u32 %s1151_s27, 4  ;;  %p941_p1 = scmp.lt.s32.totalorder %s1149_s17, 2  ;;  %s155_s28 = int_to_ptr.vmem [resolvable:$true] %s154_s28 }
  0x14   : > { %p1249_p13 = pnand %p838_p10, %p138_p11  ;;  %s32_s4 = sadd.s32 1, %s1145_s16 }
  0x15   : > { %p1258_p4 = pnand %p941_p1, %p1228_p5  ;;  %p1269_p6 = scmp.ge.s32.totalorder %s32_s4, 2 }
  0x16   : > { %s1593_s26 = scalar_select %p1249_p13, 1, 0 }
  0x17   : > { %p928_p0 = pneg %p1249_p13  ;;  %s168_s6 = sand.u32 1, %s1137_s14  }
  0x18   : > { %s1594_s29 = scalar_select %p1258_p4, 1, 0 }
  0x19   : > { %p1264_p2 = pnand %p928_p0, %p1224_p3  ;;  %s1005_s9 = scalar_lea.hbm %s1578_s0, 64 }
  0x1a   : > { %s1596_s5 = scalar_select %p1269_p6, 1, 0 }
  0x1b   : > { %p1006_p5 = scmp.ne.s32.totalorder %s1578_s0, %s1005_s9  ;;  %p1007_p10 = pneg %p1264_p2 }
  0x1c   : > { %p1012_p0 = scmp.lt.u32.totalorder %s1005_s9, %s1578_s0 }
  0x1d   : > { %p1008_p11 = pnand %p1007_p10, %p1006_p5 }
  0x1f   : > { %p1009_p1 = pneg %p1008_p11 }
  0x21   : > { %p1014_p12 = pnand %p1012_p0, %p1009_p1 }
  0x23   : > { %1017 = shalt.err (!%p1014_p12)
}
  0x24   : > { %s1018_s22 = scalar_lea.vmem %s155_s28, 64  ;;  %p1026_p3 = scmp.lt.s32.totalorder %s155_s28, %s155_s28 }
  0x25   : > { %p1019_p9 = scmp.ne.s32.totalorder %s155_s28, %s1018_s22  ;;  %p1027_p13 = scmp.lt.s32.totalorder %s1018_s22, %s1018_s22 }
  0x27   : > { %p1021_p8 = pnand %p1019_p9, %p1007_p10  ;;  %p1028_p4 = por %p1027_p13, %p1026_p3 }
  0x29   : > { %p1022_p7 = pneg %p1021_p8 }
  0x2b   : > { %p1029_p6 = pnand %p1028_p4, %p1022_p7 }
  0x2d   : > { %1032 = shalt.err (!%p1029_p6)
}
  0x2e   : > { %931 = dma.hbm_to_vmem [thread:$0]  (!%p1264_p2), %s1578_s0, 64, %s155_s28, [#allocation4]  }
  0x2f   : > { %p1597_p9 = scmp.ne.s32.totalorder %s1596_s5, 0  ;;  %s841_s8 = sshll.u32 %s168_s6, 9 }
  0x30   : > { %s853_s10 = sshll.u32 %s1145_s16, 13  ;;  %s172_s19 = scalar_lea.vmem [#allocation6], %s841_s8 }
  0x31   : > { %s1611_s4 = smov (%p1597_p9, %s32_s4), 0  ;;  %s1300_s18 = scalar_lea.hbm %s1580_s2, %s853_s10 }
  0x32   : > { %s83_s9 = ssub.s32 %s1145_s16, %s1611_s4  ;;  %s182_s22 = sshll.u32 %s172_s19, 4  ;;  %s1307_s22 = int_to_ptr.vmem [resolvable:$true] %s182_s22 }
  0x33   : > { %p86_p3 = scmp.eq.s32.totalorder %s83_s9, 0  ;;  %s1309_s5 = scalar_lea.sflag [#allocation7], %s168_s6 }
  0x34   : > { %s1033_s27 = scalar_lea.hbm %s1300_s18, 8192  ;;  %p1598_p8 = scmp.ne.s32.totalorder %s1594_s29, 0 }
  0x35   : > { %s1305_s28 = scalar_select %p86_p3, %s1137_s14, %s88_s20  }
  0x36   : > { %p1034_p7 = scmp.ne.s32.totalorder %s1300_s18, %s1033_s27  ;;  %p1035_p12 = pneg %p1598_p8 }
  0x37   : > { %s1038_s8 = scalar_lea.hbm %s1580_s2, 16384  ;;  %p1039_p2 = scmp.lt.u32.totalorder %s1300_s18, %s1580_s2 }
  0x38   : > { %p1036_p13 = pnand %p1035_p12, %p1034_p7  ;;  %p1040_p6 = scmp.lt.u32.totalorder %s1038_s8, %s1033_s27 }
  0x39   : > { %p1042_p10 = scmp.lt.u32.totalorder %s1033_s27, %s1300_s18 }
  0x3a   : > { %p1037_p4 = pneg %p1036_p13  ;;  %p1041_p5 = por %p1040_p6, %p1039_p2 }
  0x3c   : > { %p1043_p11 = por %p1042_p10, %p1041_p5 }
  0x3e   : > { %p1044_p1 = pnand %p1043_p11, %p1037_p4 }
  0x40   : > { %1047 = shalt.err (!%p1044_p1)
}
  0x41   : > { %s1048_s20 = scalar_lea.vmem %s1307_s22, 8192  ;;  %s1152_s6 = smov [#allocation6]  }
  0x42   : > { %p1049_p0 = scmp.ne.s32.totalorder %s1307_s22, %s1048_s20  ;;  %s1053_s11 = sshll.u32 %s1152_s6, 4  ;;  %s1054_s11 = int_to_ptr.vmem [resolvable:$false] %s1053_s11 }
  0x43   : > { %s1055_s19 = scalar_lea.vmem %s1054_s11, 16384  ;;  %p1056_p7 = scmp.lt.s32.totalorder %s1307_s22, %s1054_s11 }
  0x44   : > { %p1051_p9 = pnand %p1049_p0, %p1035_p12  ;;  %p1057_p13 = scmp.lt.s32.totalorder %s1055_s19, %s1048_s20 }
  0x46   : > { %p1052_p3 = pneg %p1051_p9  ;;  %p1058_p2 = por %p1057_p13, %p1056_p7 }
  0x48   : > { %p1059_p6 = pnand %p1058_p2, %p1052_p3 }
  0x4a   : > { %1062 = shalt.err (!%p1059_p6)
}
  0x4b   : > { %s1153_s27 = smov 256   ;;  %s1154_s7 = smov 16  }
  0x4c   : > { %935 = dma.hbm_to_vmem [thread:$0]  (!%p1598_p8), %s1300_s18, 8192, %s1307_s22, %s1309_s5, %s1153_s27, %s1153_s27, %s1154_s7  }
  0x4d   : > { %p1599_p12 = scmp.ne.s32.totalorder %s1593_s26, 0 }
  0x4e   : > { %p1600_p4 = scmp.ne.s32.totalorder (!%p1599_p12), %s1588_s21, 0 }
  0x4f   : > { %194 = sbr.rel (%p1599_p12) target bundleno = 903 (0x387), region = 32 }
  0x56   : > { %1116 = dma.done.wait (%p1600_p4), [#allocation4], 64  }
  0x57   : > { %1118 = vsyncadd (%p1600_p4), [#allocation4], 4294967232  ;;  %s1344_s9 = sand.u32 1, %s1133_s13   ;;  %p1601_p8 = scmp.ne.s32.totalorder %s1590_s23, 0 }
  0x58   : > { %s846_s8 = sshll.u32 %s1344_s9, 9  ;;  %s201_s10 = scalar_lea.sflag [#allocation7], %s1344_s9 }
  0x59   : > { %s1348_s30 = scalar_lea.vmem [#allocation6], %s846_s8 }
  0x5a   : > { %1120 = dma.done.wait (%p1601_p8), %s201_s10, 8192  }
  0x5b   : > { %1122 = vsyncadd (%p1601_p8), %s201_s10, 4294959104  ;;  %v236_v0 = vld [vmem:[%s1348_s30 + $0x8] sm:$0xff]  ;;  %v238_v1 = vld [vmem:[%s1348_s30 + $0x18] sm:$0xff]  ;;  %s1157_s21 = smov 126   ;;  %s1158_s23 = smov 127   ;;  %vm712_vm8 = vcmask 1041408  }
  0x5c   : > { %v235_v2 = vld [vmem:[%s1348_s30] sm:$0xff]  ;;  %v854_v3 = vpack.c.bf16 %v238_v1, %v236_v0  ;;  %v237_v4 = vld [vmem:[%s1348_s30 + $0x10] sm:$0xff]  ;;  %v240_v5 = vld [vmem:[%s1348_s30 + $0x28] sm:$0xff]  ;;  %s1159_s26 = smov 112   ;;  %s1160_s29 = smov 96  }
  0x5d   : > { %v242_v6 = vld [vmem:[%s1348_s30 + $0x38] sm:$0xff]  ;;  %v856_v7 = vpack.c.bf16 %v237_v4, %v235_v2  ;;  %v239_v9 = vld [vmem:[%s1348_s30 + $0x20] sm:$0xff]  ;;  %v241_v10 = vld [vmem:[%s1348_s30 + $0x30] sm:$0xff]  ;;  %s1161_s18 = smov 111   ;;  %s1162_s22 = smov 110  }
  0x5e   : > { %v858_v8 = vpack.c.bf16 %v242_v6, %v240_v5  ;;  %v244_v11 = vld [vmem:[%s1348_s30 + $0x48] sm:$0xff]  ;;  %855 = vmatprep.subr.bf16.mxu0 %v854_v3  ;;  %v246_v12 = vld [vmem:[%s1348_s30 + $0x58] sm:$0xff]  ;;  %v860_v13 = vpack.c.bf16 %v241_v10, %v239_v9  ;;  %v243_v15 = vld [vmem:[%s1348_s30 + $0x40] sm:$0xff]  ;;  %s1163_s5 = smov 95   ;;  %s1164_s20 = smov 94  }
  0x5f   : > { %857 = vmatpush1.bf16.msra.mxu0 %v856_v7  ;;  %v862_v14 = vpack.c.bf16 %v246_v12, %v244_v11  ;;  %v245_v16 = vld [vmem:[%s1348_s30 + $0x50] sm:$0xff]  ;;  %v248_v17 = vld [vmem:[%s1348_s30 + $0x68] sm:$0xff]  ;;  %v250_v18 = vld [vmem:[%s1348_s30 + $0x78] sm:$0xff]  ;;  %s847_s19 = sshll.u32 %s1344_s9, 3  ;;  %s850_s8 = sshll.u32 %s1141_s15, 7 }
  0x60   : > { %859 = vmatprep.subr.bf16.mxu0 %v858_v8  ;;  %v864_v19 = vpack.c.bf16 %v245_v16, %v243_v15  ;;  %v866_v20 = vpack.c.bf16 %v250_v18, %v248_v17  ;;  %v247_v21 = vld [vmem:[%s1348_s30 + $0x60] sm:$0xff]  ;;  %v249_v22 = vld [vmem:[%s1348_s30 + $0x70] sm:$0xff]  ;;  %v252_v23 = vld [vmem:[%s1348_s30 + $0x88] sm:$0xff]  ;;  %s226_s27 = scalar_lea.vmem [#allocation8], %s847_s19  ;;  %p1602_p10 = scmp.ne.s32.totalorder %s1591_s24, 0 }
  0x61   : > { %v254_v24 = vld [vmem:[%s1348_s30 + $0x98] sm:$0xff]  ;;  %v868_v25 = vpack.c.bf16 %v249_v22, %v247_v21  ;;  %v251_v27 = vld [vmem:[%s1348_s30 + $0x80] sm:$0xff]  ;;  %v253_v28 = vld [vmem:[%s1348_s30 + $0x90] sm:$0xff]  ;;  %s741_s7 = sshll.u32 %s226_s27, 4  ;;  %s1165_s15 = smov [#allocation8]   ;;  %s1526_s7 = int_to_ptr.vmem [resolvable:$true] %s741_s7 }
  0x62   : > { %v870_v26 = vpack.c.bf16 %v254_v24, %v252_v23  ;;  %v256_v29 = vld [vmem:[%s1348_s30 + $0xa8] sm:$0xff]  ;;  %v258_v30 = vld [vmem:[%s1348_s30 + $0xb8] sm:$0xff]  ;;  %v872_v31 = vpack.c.bf16 %v253_v28, %v251_v27  ;;  %v255_v33 = vld [vmem:[%s1348_s30 + $0xa0] sm:$0xff] }
  0x63   : > { %861 = vmatpush1.bf16.msra.mxu0 %v860_v13  ;;  %v874_v32 = vpack.c.bf16 %v258_v30, %v256_v29  ;;  %v257_v34 = vld [vmem:[%s1348_s30 + $0xb0] sm:$0xff]  ;;  %v260_v35 = vld [vmem:[%s1348_s30 + $0xc8] sm:$0xff]  ;;  %v262_v36 = vld [vmem:[%s1348_s30 + $0xd8] sm:$0xff] }
  0x64   : > { %863 = vmatprep.subr.bf16.mxu0 %v862_v14  ;;  %v876_v37 = vpack.c.bf16 %v257_v34, %v255_v33  ;;  %v878_v38 = vpack.c.bf16 %v262_v36, %v260_v35  ;;  %v259_v39 = vld [vmem:[%s1348_s30 + $0xc0] sm:$0xff]  ;;  %v261_v40 = vld [vmem:[%s1348_s30 + $0xd0] sm:$0xff]  ;;  %v1382_v41 = vld.sshfl [vmem:[#allocation3] sm:$0x33 pattern:$0x76325410] }
  0x65   : > { %v264_v42 = vld [vmem:[%s1348_s30 + $0xe8] sm:$0xff]  ;;  %v266_v43 = vld [vmem:[%s1348_s30 + $0xf8] sm:$0xff]  ;;  %v308_v44 = vcombine.high %v1382_v41, %v1382_v41  ;;  %v880_v45 = vpack.c.bf16 %v261_v40, %v259_v39  ;;  %v263_v47 = vld [vmem:[%s1348_s30 + $0xe0] sm:$0xff]  ;;  %v1155_v34 = vmov 0.0   ;;  %v1156_v35 = vmov 1983009808  }
  0x66   : > { %v882_v46 = vpack.c.bf16 %v266_v43, %v264_v42  ;;  %v265_v48 = vld [vmem:[%s1348_s30 + $0xf0] sm:$0xff]  ;;  %v268_v49 = vld [vmem:[%s1348_s30 + $0x108] sm:$0xff]  ;;  %v270_v50 = vld [vmem:[%s1348_s30 + $0x118] sm:$0xff]  ;;  %233 = vst [vmem:[#allocation2] sm:$0xf] %v1155_v34  ;;  %v386_v36 = vunpack.c.l.s4 %v1156_v35 }
  0x67   : > { %865 = vmatpush1.bf16.msra.mxu0 %v864_v19  ;;  %375 = vmatprep.mubr.f32.mxu0 %v308_v44  ;;  %v884_v51 = vpack.c.bf16 %v265_v48, %v263_v47  ;;  %v886_v52 = vpack.c.bf16 %v270_v50, %v268_v49  ;;  %v267_v53 = vld [vmem:[%s1348_s30 + $0x100] sm:$0xff]  ;;  %v269_v54 = vld [vmem:[%s1348_s30 + $0x110] sm:$0xff]  ;;  %v272_v55 = vld [vmem:[%s1348_s30 + $0x128] sm:$0xff] }
  0x68   : > { %867 = vmatprep.subr.bf16.mxu0 %v866_v20  ;;  %v274_v56 = vld [vmem:[%s1348_s30 + $0x138] sm:$0xff]  ;;  %v888_v57 = vpack.c.bf16 %v269_v54, %v267_v53  ;;  %v271_v59 = vld [vmem:[%s1348_s30 + $0x120] sm:$0xff]  ;;  %v273_v60 = vld [vmem:[%s1348_s30 + $0x130] sm:$0xff] }
  0x69   : > { %v890_v58 = vpack.c.bf16 %v274_v56, %v272_v55  ;;  %v276_v61 = vld [vmem:[%s1348_s30 + $0x148] sm:$0xff]  ;;  %v278_v62 = vld [vmem:[%s1348_s30 + $0x158] sm:$0xff]  ;;  %v892_v63 = vpack.c.bf16 %v273_v60, %v271_v59  ;;  %v275_v1 = vld [vmem:[%s1348_s30 + $0x140] sm:$0xff] }
  0x6a   : > { %v894_v0 = vpack.c.bf16 %v278_v62, %v276_v61  ;;  %v277_v2 = vld [vmem:[%s1348_s30 + $0x150] sm:$0xff]  ;;  %v280_v3 = vld [vmem:[%s1348_s30 + $0x168] sm:$0xff]  ;;  %v282_v4 = vld [vmem:[%s1348_s30 + $0x178] sm:$0xff] }
  0x6b   : > { %869 = vmatpush1.bf16.msra.mxu0 %v868_v25  ;;  %v896_v5 = vpack.c.bf16 %v277_v2, %v275_v1  ;;  %v898_v6 = vpack.c.bf16 %v282_v4, %v280_v3  ;;  %v279_v7 = vld [vmem:[%s1348_s30 + $0x160] sm:$0xff]  ;;  %v281_v8 = vld [vmem:[%s1348_s30 + $0x170] sm:$0xff]  ;;  %v284_v9 = vld [vmem:[%s1348_s30 + $0x188] sm:$0xff] }
  0x6c   : > { %871 = vmatprep.subr.bf16.mxu0 %v870_v26  ;;  %v286_v10 = vld [vmem:[%s1348_s30 + $0x198] sm:$0xff]  ;;  %v900_v11 = vpack.c.bf16 %v281_v8, %v279_v7  ;;  %v283_v13 = vld [vmem:[%s1348_s30 + $0x180] sm:$0xff]  ;;  %v285_v14 = vld [vmem:[%s1348_s30 + $0x190] sm:$0xff] }
  0x6d   : > { %v902_v12 = vpack.c.bf16 %v286_v10, %v284_v9  ;;  %v288_v15 = vld [vmem:[%s1348_s30 + $0x1a8] sm:$0xff]  ;;  %v290_v16 = vld [vmem:[%s1348_s30 + $0x1b8] sm:$0xff]  ;;  %v904_v17 = vpack.c.bf16 %v285_v14, %v283_v13  ;;  %v287_v19 = vld [vmem:[%s1348_s30 + $0x1a0] sm:$0xff] }
  0x6e   : > { %v906_v18 = vpack.c.bf16 %v290_v16, %v288_v15  ;;  %v289_v20 = vld [vmem:[%s1348_s30 + $0x1b0] sm:$0xff]  ;;  %v292_v21 = vld [vmem:[%s1348_s30 + $0x1c8] sm:$0xff]  ;;  %v294_v22 = vld [vmem:[%s1348_s30 + $0x1d8] sm:$0xff] }
  0x6f   : > { %873 = vmatpush1.bf16.msra.mxu0 %v872_v31  ;;  %v908_v23 = vpack.c.bf16 %v289_v20, %v287_v19  ;;  %v910_v24 = vpack.c.bf16 %v294_v22, %v292_v21  ;;  %v291_v25 = vld [vmem:[%s1348_s30 + $0x1c0] sm:$0xff]  ;;  %v293_v26 = vld [vmem:[%s1348_s30 + $0x1d0] sm:$0xff]  ;;  %v296_v27 = vld [vmem:[%s1348_s30 + $0x1e8] sm:$0xff] }
  0x70   : > { %875 = vmatprep.subr.bf16.mxu0 %v874_v32  ;;  %v298_v28 = vld [vmem:[%s1348_s30 + $0x1f8] sm:$0xff]  ;;  %v912_v29 = vpack.c.bf16 %v293_v26, %v291_v25  ;;  %v295_v31 = vld [vmem:[%s1348_s30 + $0x1e0] sm:$0xff]  ;;  %v297_v32 = vld [vmem:[%s1348_s30 + $0x1f0] sm:$0xff] }
  0x71   : > { %v914_v30 = vpack.c.bf16 %v298_v28, %v296_v27  ;;  %v916_v33 = vpack.c.bf16 %v297_v32, %v295_v31 }
  0x73   : > { %877 = vmatpush1.bf16.msra.mxu0 %v876_v37  ;;  %v388_v37 = vlaneseq }
  0x74   : > { %879 = vmatprep.subr.bf16.mxu0 %v878_v38  ;;  %v387_v38 = vunpack.c.0.s8 %v386_v36 }
  0x75   : > { %v1423_v39 = vshrl.u32 %v388_v37, 7  ;;  %v1433_v50 = vand.u32 127, %v388_v37 }
  0x77   : > { %881 = vmatpush1.bf16.msra.mxu0 %v880_v45  ;;  %v1426_v42 = vsub.s32 %v387_v38, %v1423_v39  ;;  %v299_v45 = vld [vmem:[#allocation2] sm:$0xf]  ;;  %vm435_vm0 = vcmp.lt.s32.totalorder %v1433_v50, 126  ;;  %vm416_vm1 = vcmp.lt.s32.totalorder %v1433_v50, 127  ;;  %vm465_vm2 = vcmp.lt.s32.totalorder %v1433_v50, 112 }
  0x78   : > { %883 = vmatprep.subr.bf16.mxu0 %v882_v46  ;;  %vm484_vm3 = vcmp.lt.s32.totalorder %v1433_v50, 96  ;;  %vm571_vm4 = vcmp.lt.s32.totalorder %v1433_v50, 111  ;;  %vm594_vm5 = vcmp.lt.s32.totalorder %v1433_v50, 110  ;;  %vm639_vm6 = vcmp.lt.s32.totalorder %v1433_v50, 95 }
  0x79   : > { %v685_v26 = vsub.s32 0, %v1423_v39  ;;  %vm662_vm7 = vcmp.lt.s32.totalorder %v1433_v50, 94 }
  0x7b   : > { %885 = vmatpush1.bf16.msra.mxu0 %v884_v51 }
  0x7c   : > { %887 = vmatprep.subr.bf16.mxu0 %v886_v52 }
  0x7f   : > { %889 = vmatpush1.bf16.msra.mxu0 %v888_v57 }
  0x80   : > { %891 = vmatprep.subr.bf16.mxu0 %v890_v58 }
  0x83   : > { %893 = vmatpush1.bf16.msra.mxu0 %v892_v63 }
  0x84   : > { %895 = vmatprep.subr.bf16.mxu0 %v894_v0 }
  0x87   : > { %897 = vmatpush1.bf16.msra.mxu0 %v896_v5 }
  0x88   : > { %899 = vmatprep.subr.bf16.mxu0 %v898_v6 }
  0x8b   : > { %901 = vmatpush1.bf16.msra.mxu0 %v900_v11 }
  0x8c   : > { %903 = vmatprep.subr.bf16.mxu0 %v902_v12 }
  0x8f   : > { %905 = vmatpush1.bf16.msra.mxu0 %v904_v17 }
  0x90   : > { %907 = vmatprep.subr.bf16.mxu0 %v906_v18 }
  0x93   : > { %909 = vmatpush1.bf16.msra.mxu0 %v908_v23 }
  0x94   : > { %911 = vmatprep.subr.bf16.mxu0 %v910_v24 }
  0x97   : > { %913 = vmatpush1.bf16.msra.mxu0 %v912_v29 }
  0x98   : > { %915 = vmatprep.subr.bf16.mxu0 %v914_v30 }
  0x9b   : > { %917 = vmatpush1.bf16.msra.mxu0 %v916_v33 }
  0x9e   : > { %376 = vmatmul.mubr.f32.vlgmr.msra.gmra.mrb[0].mxu0 %v1382_v41 }
 0x171   : > { %v377_v40 = vpop.f32.mrb[0].mxu0 }
 0x172   : > { %v379_v43 = vpop.f32.mrb[1].mxu0 }
 0x173   : > { %v384_v44 = vcombine.low %v377_v40, %v379_v43 }
 0x175   : > { %v391_v46 = vrot.slane %v384_v44, %v1426_v42 }
 0x177   : > { %v393_v47 = vadd.f32 %v391_v46, %v299_v45 }
 0x179   : > { %394 = vst [vmem:[#allocation2] sm:$0xf] %v393_v47 }
 0x180   : > { %v1429_v41 = vld [vmem:[#allocation2] sm:$0xf] }
 0x181   : > { %v406_v48 = vrot.slane %v1429_v41, %v1426_v42 }
 0x183   : > { %431 = vrot.lane.b32.xlu1 %v406_v48, %s1157_s21  ;;  %410 = vrot.lane.b32.xlu0 %v406_v48, %s1158_s23  ;;  %v407_v49 = vcombine.high %v406_v48, %v406_v48 }
 0x187   : > { %433 = vrot.lane.b32.xlu1 %v407_v49, %s1157_s21  ;;  %412 = vrot.lane.b32.xlu0 %v407_v49, %s1158_s23  ;;  %s1531_s23 = scalar_lea.hbm %s1581_s3, %s850_s8 }
 0x1f5   : > { %v432_v51 = vpop.permute.xlu1 %431  ;;  %v411_v52 = vpop.permute.xlu0 %410 }
 0x1f9   : > { %v434_v53 = vpop.permute.xlu1 %433  ;;  %v413_v54 = vpop.permute.xlu0 %412 }
 0x1fa   : > { %v1437_v55 = vsel %vm435_vm0, %v432_v51, %v434_v53  ;;  %v1439_v56 = vsel %vm435_vm0, %v434_v53, %v432_v51  ;;  %v417_v57 = vsel %vm416_vm1, %v411_v52, %v413_v54  ;;  %v1441_v58 = vsel %vm416_vm1, %v413_v54, %v411_v52 }
 0x1fb   : > { %v440_v59 = vcombine.low %v1437_v55, %v1439_v56  ;;  %v421_v60 = vcombine.low %v417_v57, %v1441_v58 }
 0x1fd   : > { %v428_v61 = vrot.slane %v421_v60, %v1426_v42  ;;  %v447_v62 = vrot.slane %v440_v59, %v1426_v42 }
 0x1ff   : > { %v430_v63 = vadd.f32 %v428_v61, %v1429_v41  ;;  %v689_v61 = vsub.s32 1, %v1423_v39 }
 0x201   : > { %v449_v0 = vadd.f32 %v447_v62, %v430_v63 }
 0x203   : > { %v457_v1 = vrot.slane %v449_v0, %v1426_v42 }
 0x205   : > { %461 = vrot.lane.b32.xlu0 %v457_v1, %s1159_s26  ;;  %v458_v2 = vcombine.high %v457_v1, %v457_v1 }
 0x207   : > { %463 = vrot.lane.b32.xlu1 %v458_v2, %s1159_s26 }
 0x209   : > { %480 = vrot.lane.b32.xlu0 %v457_v1, %s1160_s29 }
 0x20b   : > { %482 = vrot.lane.b32.xlu1 %v458_v2, %s1160_s29 }
 0x20d   : > { %545 = vrot.lane.b32.xlu0 %v406_v48, %s1159_s26 }
 0x20f   : > { %547 = vrot.lane.b32.xlu1 %v407_v49, %s1159_s26  ;;  %s728_s26 = scalar_lea.sflag [#allocation5], %s1344_s9 }
 0x211   : > { %567 = vrot.lane.b32.xlu0 %v406_v48, %s1161_s18 }
 0x213   : > { %569 = vrot.lane.b32.xlu1 %v407_v49, %s1161_s18  ;;  %s1067_s18 = sshll.u32 %s1165_s15, 4  ;;  %s1068_s18 = int_to_ptr.vmem [resolvable:$false] %s1067_s18 }
 0x214   : > { %p1070_p0 = scmp.lt.s32.totalorder %s1526_s7, %s1068_s18 }
 0x215   : > { %590 = vrot.lane.b32.xlu0 %v406_v48, %s1162_s22 }
 0x217   : > { %592 = vrot.lane.b32.xlu1 %v407_v49, %s1162_s22  ;;  %s1069_s22 = scalar_lea.vmem %s1068_s18, 256 }
 0x219   : > { %613 = vrot.lane.b32.xlu0 %v406_v48, %s1160_s29 }
 0x21b   : > { %615 = vrot.lane.b32.xlu1 %v407_v49, %s1160_s29  ;;  %s1063_s29 = scalar_lea.vmem %s1526_s7, 128 }
 0x21c   : > { %p1064_p5 = scmp.ne.s32.totalorder %s1526_s7, %s1063_s29  ;;  %p1071_p9 = scmp.lt.s32.totalorder %s1069_s22, %s1063_s29 }
 0x21d   : > { %635 = vrot.lane.b32.xlu0 %v406_v48, %s1163_s5 }
 0x21e   : > { %p1065_p11 = pnand %p1064_p5, %p1602_p10  ;;  %p1072_p3 = por %p1071_p9, %p1070_p0 }
 0x21f   : > { %637 = vrot.lane.b32.xlu1 %v407_v49, %s1163_s5 }
 0x220   : > { %p1066_p1 = pneg %p1065_p11 }
 0x221   : > { %658 = vrot.lane.b32.xlu0 %v406_v48, %s1164_s20 }
 0x222   : > { %p1073_p7 = pnand %p1072_p3, %p1066_p1 }
 0x223   : > { %660 = vrot.lane.b32.xlu1 %v407_v49, %s1164_s20 }
 0x277   : > { %v462_v3 = vpop.permute.xlu0 %461 }
 0x279   : > { %v464_v4 = vpop.permute.xlu1 %463 }
 0x27a   : > { %v466_v5 = vsel %vm465_vm2, %v462_v3, %v464_v4  ;;  %v467_v6 = vsel %vm465_vm2, %v464_v4, %v462_v3 }
 0x27b   : > { %v470_v7 = vcombine.low %v466_v5, %v467_v6  ;;  %v481_v8 = vpop.permute.xlu0 %480 }
 0x27d   : > { %v477_v9 = vrot.slane %v470_v7, %v1426_v42  ;;  %v483_v10 = vpop.permute.xlu1 %482  ;;  %v681_v7 = vld [vmem:[%s1579_s1] sm:$0x3] }
 0x27e   : > { %v485_v11 = vsel %vm484_vm3, %v481_v8, %v483_v10  ;;  %v486_v12 = vsel %vm484_vm3, %v483_v10, %v481_v8 }
 0x27f   : > { %v489_v13 = vcombine.low %v485_v11, %v486_v12  ;;  %v546_v14 = vpop.permute.xlu0 %545  ;;  %v479_v15 = vadd.f32 %v477_v9, %v449_v0 }
 0x281   : > { %v496_v16 = vrot.slane %v489_v13, %v1426_v42  ;;  %v548_v17 = vpop.permute.xlu1 %547 }
 0x282   : > { %v549_v24 = vsel %vm465_vm2, %v546_v14, %v548_v17  ;;  %v550_v25 = vsel %vm465_vm2, %v548_v17, %v546_v14 }
 0x283   : > { %v498_v18 = vadd.f32 %v496_v16, %v479_v15  ;;  %v568_v19 = vpop.permute.xlu0 %567  ;;  %v686_v16 = vrot.slane %v681_v7, %v685_v26 }
 0x285   : > { %v499_v20 = vmul.f32 0.11111111, %v498_v18  ;;  %v570_v21 = vpop.permute.xlu1 %569 }
 0x286   : > { %v572_v30 = vsel %vm571_vm4, %v568_v19, %v570_v21  ;;  %v573_v33 = vsel %vm571_vm4, %v570_v21, %v568_v19 }
 0x287   : > { %v1464_v22 = vrot.slane %v499_v20, %v1426_v42  ;;  %v591_v23 = vpop.permute.xlu0 %590  ;;  %v500_v32 = vsub.f32 %v1429_v41, %v499_v20 }
 0x289   : > { %v1475_v27 = vcombine.high %v1464_v22, %v1464_v22  ;;  %v513_v28 = vsub.f32 %v417_v57, %v1464_v22  ;;  %v529_v29 = vsub.f32 %v1437_v55, %v1464_v22  ;;  %v593_v31 = vpop.permute.xlu1 %592  ;;  %v551_v38 = vsub.f32 %v549_v24, %v1464_v22 }
 0x28a   : > { %v595_v34 = vsel %vm594_vm5, %v591_v23, %v593_v31  ;;  %v596_v35 = vsel %vm594_vm5, %v593_v31, %v591_v23  ;;  %v574_v40 = vsub.f32 %v572_v30, %v1464_v22  ;;  %v501_v62 = vmul.f32 %v500_v32, %v500_v32 }
 0x28b   : > { %v514_v36 = vsub.f32 %v1441_v58, %v1475_v27  ;;  %v530_v37 = vsub.f32 %v1439_v56, %v1475_v27  ;;  %v614_v43 = vpop.permute.xlu0 %613  ;;  %v515_v44 = vmul.f32 %v513_v28, %v513_v28  ;;  %v531_v45 = vmul.f32 %v529_v29, %v529_v29 }
 0x28c   : > { %v552_v46 = vsub.f32 %v550_v25, %v1475_v27  ;;  %v575_v47 = vsub.f32 %v573_v33, %v1475_v27  ;;  %v597_v49 = vsub.f32 %v595_v34, %v1464_v22  ;;  %v598_v51 = vsub.f32 %v596_v35, %v1475_v27 }
 0x28d   : > { %v516_v41 = vmul.f32 %v514_v36, %v514_v36  ;;  %v532_v48 = vmul.f32 %v530_v37, %v530_v37  ;;  %v616_v52 = vpop.permute.xlu1 %615  ;;  %v553_v59 = vmul.f32 %v551_v38, %v551_v38  ;;  %v576_v63 = vmul.f32 %v574_v40, %v574_v40 }
 0x28e   : > { %v554_v53 = vmul.f32 %v552_v46, %v552_v46  ;;  %v577_v54 = vmul.f32 %v575_v47, %v575_v47  ;;  %v617_v55 = vsel %vm484_vm3, %v614_v43, %v616_v52  ;;  %v618_v56 = vsel %vm484_vm3, %v616_v52, %v614_v43 }
 0x28f   : > { %v519_v57 = vcombine.low %v515_v44, %v516_v41  ;;  %v535_v58 = vcombine.low %v531_v45, %v532_v48  ;;  %v636_v60 = vpop.permute.xlu0 %635  ;;  %v619_v0 = vsub.f32 %v617_v55, %v1464_v22  ;;  %v620_v1 = vsub.f32 %v618_v56, %v1475_v27 }
 0x290   : > { %v557_v3 = vcombine.low %v553_v59, %v554_v53  ;;  %v599_v4 = vmul.f32 %v597_v49, %v597_v49  ;;  %v600_v5 = vmul.f32 %v598_v51, %v598_v51  ;;  %v580_v9 = vcombine.low %v576_v63, %v577_v54 }
 0x291   : > { %v526_v2 = vrot.slane %v519_v57, %v1426_v42  ;;  %v638_v6 = vpop.permute.xlu1 %637  ;;  %v542_v8 = vrot.slane %v535_v58, %v1426_v42  ;;  %v621_v39 = vmul.f32 %v619_v0, %v619_v0  ;;  %v622_v11 = vmul.f32 %v620_v1, %v620_v1 }
 0x292   : > { %v640_v12 = vsel %vm639_vm6, %v636_v60, %v638_v6  ;;  %v641_v13 = vsel %vm639_vm6, %v638_v6, %v636_v60  ;;  %v564_v18 = vrot.slane %v557_v3, %v1426_v42  ;;  %v603_v19 = vcombine.low %v599_v4, %v600_v5 }
 0x293   : > { %v528_v10 = vadd.f32 %v526_v2, %v501_v62  ;;  %v642_v14 = vsub.f32 %v640_v12, %v1464_v22  ;;  %v643_v15 = vsub.f32 %v641_v13, %v1475_v27  ;;  %v659_v20 = vpop.permute.xlu0 %658  ;;  %v690_v23 = vrot.slane %v681_v7, %v689_v61 }
 0x294   : > { %v587_v24 = vrot.slane %v580_v9, %v1426_v42  ;;  %v625_v31 = vcombine.low %v621_v39, %v622_v11  ;;  %v610_v35 = vrot.slane %v603_v19, %v1426_v42 }
 0x295   : > { %v544_v17 = vadd.f32 %v542_v8, %v528_v10  ;;  %v661_v21 = vpop.permute.xlu1 %660  ;;  %v644_v25 = vmul.f32 %v642_v14, %v642_v14  ;;  %v645_v28 = vmul.f32 %v643_v15, %v643_v15  ;;  %v691_v44 = vcombine.low %v686_v16, %v690_v23 }
 0x296   : > { %v663_v29 = vsel %vm662_vm7, %v659_v20, %v661_v21  ;;  %v664_v32 = vsel %vm662_vm7, %v661_v21, %v659_v20  ;;  %v632_v43 = vrot.slane %v625_v31, %v1426_v42 }
 0x297   : > { %v566_v30 = vadd.f32 %v564_v18, %v544_v17  ;;  %v665_v26 = vsub.f32 %v663_v29, %v1464_v22  ;;  %v666_v33 = vsub.f32 %v664_v32, %v1475_v27  ;;  %v648_v36 = vcombine.low %v644_v25, %v645_v28 }
 0x298   : > { %v698_v22 = vrot.slane %v691_v44, %v1426_v42 }
 0x299   : > { %v589_v34 = vadd.f32 %v587_v24, %v566_v30  ;;  %v667_v37 = vmul.f32 %v665_v26, %v665_v26  ;;  %v668_v38 = vmul.f32 %v666_v33, %v666_v33  ;;  %v655_v47 = vrot.slane %v648_v36, %v1426_v42 }
 0x29b   : > { %v612_v40 = vadd.f32 %v610_v35, %v589_v34  ;;  %v671_v45 = vcombine.low %v667_v37, %v668_v38 }
 0x29d   : > { %v634_v46 = vadd.f32 %v632_v43, %v612_v40  ;;  %v678_v41 = vrot.slane %v671_v45, %v1426_v42 }
 0x29f   : > { %v657_v50 = vadd.f32 %v655_v47, %v634_v46 }
 0x2a1   : > { %v680_v27 = vadd.f32 %v678_v41, %v657_v50 }
 0x2a3   : > { %v700_v48 = vmul.f32 %v698_v22, %v680_v27 }
 0x2a5   : > { %v708_v49 = vrot.slane %v700_v48, %v1426_v42 }
 0x2a7   : > { %v709_v51 = vcombine.high %v708_v49, %v708_v49  ;;  %v713_v52 = vsel %vm712_vm8, %v708_v49, 0.0 }
 0x2a9   : > { %v714_v53 = vsel %vm712_vm8, %v709_v51, 0.0 }
 0x2aa   : > { %v715_v54 = vadd.f32 %v714_v53, %v713_v52 }
 0x2ac   : > { %716 = vadd.xlane.f32.xlu0 %v715_v54 }
 0x339   : > { %v717_v55 = vpop.xlane.xlu0 %716 }
 0x33a   : > { %v718_v56 = vrot.slane %v717_v55, 4 }
 0x33c   : > { %v719_v57 = vadd.f32 %v718_v56, %v717_v55 }
 0x33e   : > { %v720_v58 = vrot.slane %v719_v57, 2 }
 0x340   : > { %v721_v59 = vadd.f32 %v720_v58, %v719_v57 }
 0x342   : > { %v722_v60 = vrot.slane %v721_v59, 1 }
 0x344   : > { %v723_v61 = vadd.f32 %v722_v60, %v721_v59 }
 0x346   : > { %918 = vpush %v723_v61 }
 0x377   : > { %s919_s10 = spop %918 }
 0x378   : > { %v725_v42 = vstv %s919_s10 }
 0x379   : > { %726 = vst [vmem:[%s226_s27] sm:$0xff] %v725_v42 }
 0x37a   : > { %1076 = shalt.err (!%p1073_p7)
}
 0x37b   : > { %s1077_s9 = scalar_lea.hbm %s1531_s23, 128  ;;  %s1081_s6 = scalar_lea.hbm %s1581_s3, 256 }
 0x37c   : > { %p1078_p13 = scmp.ne.s32.totalorder %s1531_s23, %s1077_s9  ;;  %p1082_p12 = scmp.lt.u32.totalorder %s1531_s23, %s1581_s3 }
 0x37d   : > { %p1083_p4 = scmp.lt.u32.totalorder %s1081_s6, %s1077_s9  ;;  %p1085_p5 = scmp.lt.u32.totalorder %s1077_s9, %s1531_s23 }
 0x37e   : > { %p1079_p2 = pnand %p1078_p13, %p1602_p10 }
 0x37f   : > { %p1084_p8 = por %p1083_p4, %p1082_p12 }
 0x380   : > { %p1080_p6 = pneg %p1079_p2 }
 0x381   : > { %p1086_p11 = por %p1085_p5, %p1084_p8 }
 0x383   : > { %p1087_p1 = pnand %p1086_p11, %p1080_p6 }
 0x385   : > { %1090 = shalt.err (!%p1087_p1)
}
 0x386   : > { %926 = dma.vmem_to_hbm [thread:$0]  (%p1602_p10), %s1526_s7, 128, %s1531_s23, %s728_s26  }
 0x387 PF: > { %s753_s27 = sand.u32 1, %s1129_s12   ;;  %p1603_p0 = scmp.ne.s32.totalorder %s1592_s25, 0 }
 0x388   : > { %p1604_p9 = scmp.ge.s32.totalorder %s1149_s17, 2  ;;  %s754_s8 = scalar_lea.sflag [#allocation5], %s753_s27 }
 0x38a   : > { %p937_p3 = pnand %p1604_p9, %p1603_p0 }
 0x38c   : > { %1124 = dma.done.wait (!%p937_p3), %s754_s8, 128  }
 0x38d   : > { %1126 = vsyncadd (!%p937_p3), %s754_s8, 4294967168  ;;  %s20_s17 = sadd.s32 1, %s1149_s17   ;;  %s1605_s12 = smov %s1133_s13 }
 0x38e   : > { %p17_p7 = scmp.ge.s32.totalorder %s20_s17, 4   ;;  %s1606_s13 = smov %s1137_s14 }
 0x38f   : > { %s1607_s14 = smov %s1305_s28  ;;  %s1608_s15 = smov %s1145_s16 }
 0x390   : > { %s1609_s16 = smov %s1611_s4  ;;  %19 = sbr.rel (!%p17_p7) target bundleno = 7 (0x7), region = 91 }
 0x397   :  { %759 = vsyncpa [#allocation4], 1 }
 0x398   :  { %761 = vsyncpa [#allocation4 + $0x1], 1 }
 0x399   :  { %762 = vsyncpa [#allocation7], 1 }
 0x39a   :  { %764 = vsyncpa [#allocation7 + $0x1], 1 }
 0x39b   :  { %765 = vsyncpa [#allocation5], 1 }
 0x39c   :  { %767 = vsyncpa [#allocation5 + $0x1], 1 }

</bundles_post_ra>
